<compile_context>
chip_gen: v7x
topology: tpu7x:2x2x1
jax: 0.10.0
libtpu: 0.0.40
codegen_flags: <defaults>
</compile_context>

<pallas_src>
import functools

import jax
import jax.numpy as jnp
from jax.experimental import pallas as pl
from jax.experimental.pallas import tpu as pltpu


def vlbl_kernel(posw_ref, posb_ref, w_ref, c_ref, bias_ref, out_ref, *,
                neighbor_size, embed_dim, compute_dtype):
    # posw_ref: SMEM (N,) f32   posb_ref: SMEM (1,) f32
    # w_ref:    VMEM (TR, H)        word embeddings for this row tile
    # c_ref:    VMEM (TR, N*H)      context embeddings, packed neighbor-minor
    # bias_ref / out_ref: VMEM (TR, 1) f32
    n, h = neighbor_size, embed_dim

    # 1x1 "conv" over neighbors as an FMA chain: mixed = pos_b + sum_n pos_w[n]*c_n.
    mixed = posw_ref[0].astype(compute_dtype) * c_ref[:, 0:h].astype(compute_dtype)
    for i in range(1, n):
        mixed = mixed + (posw_ref[i].astype(compute_dtype)
                         * c_ref[:, i * h:(i + 1) * h].astype(compute_dtype))
    mixed = mixed + posb_ref[0].astype(compute_dtype)

    w = w_ref[...].astype(compute_dtype)                      # (TR, H)
    p = (w * mixed).astype(jnp.float32)                       # f32 before reduction

    # Single lane reduction per tile (was N+1); f32 accumulation.
    out_ref[...] = jnp.sum(p, axis=-1, keepdims=True) + bias_ref[...]


def vlbl_forward(context_ids, gram_ids, params, *, compute_dtype=jnp.float32):
    """context_ids: (B, N, S) int, gram_ids: (B, 1, S) int -> (B, 1, S) f32."""
    word_emb = params["word_embed"]                  # (V, H)  bf16 (or f32)
    ctx_emb = params["context_embed"]                # (V, H)
    pos_w = params["pos_w"].astype(jnp.float32)      # (N,)  conv weight (1,N,1,1) squeezed
    pos_b = params["pos_b"].astype(jnp.float32)      # (1,)  conv bias
    bias = params["bias"].astype(jnp.float32)        # (V,)

    B, X, S = gram_ids.shape
    assert X == 1, "kernel implements the standard vLBL case gram.shape[1] == 1"
    N = context_ids.shape[1]
    H = word_emb.shape[1]
    R = B * S

    # ---- Byte-based row tiling, clamped to the chip's real VMEM capacity. ----
    esz = jnp.dtype(word_emb.dtype).itemsize
    emb_row_bytes = (N + 1) * H * esz                # streamed embedding bytes per row
    # (TR,1) f32 bias/out blocks are lane-padded to 128 lanes in VMEM: 512 B/row each.
    vmem_row_bytes = emb_row_bytes + 2 * 512

    try:
        vmem_cap = int(pltpu.get_tpu_info().vmem_capacity_bytes)
    except Exception:
        vmem_cap = 64 * 2**20                        # v7x per-TensorCore floor

    per_buf_budget = min(6 * 2**20, vmem_cap // 5)   # one pipelined copy of all blocks
    TR = (per_buf_budget // vmem_row_bytes // 128) * 128
    TR = max(128, min(TR, 4096, pl.cdiv(R, 128) * 128))
    R_pad = pl.cdiv(R, TR) * TR
    grid = (R_pad // TR,)

    tile_phys = TR * vmem_row_bytes                  # one buffered copy, padded layouts
    vmem_limit = int(min(int(0.9 * vmem_cap), max(32 * 2**20, 3 * tile_phys)))

    # ---- Index plumbing (cheap int32 ops; never transpose the H-wide data). ----
    gram_flat = gram_ids.reshape(R).astype(jnp.int32)                        # (R,)
    ctx_rn = jnp.transpose(context_ids, (0, 2, 1)).reshape(R, N).astype(jnp.int32)
    pad = R_pad - R
    if pad:
        gram_flat = jnp.pad(gram_flat, (0, pad))     # pad rows reuse idx 0; sliced off below
        ctx_rn = jnp.pad(ctx_rn, ((0, pad), (0, 0)))

    # ---- Embedding gathers (plain JAX glue) directly in kernel-native layout. ----
    w_e = word_emb[gram_flat]                        # (R_pad, H)
    c_e = ctx_emb[ctx_rn].reshape(R_pad, N * H)      # (R_pad, N*H), contiguous per row
    b_g = bias[gram_flat][:, None]                   # (R_pad, 1) f32

    kern = functools.partial(vlbl_kernel, neighbor_size=N, embed_dim=H,
                             compute_dtype=compute_dtype)
    out = pl.pallas_call(
        kern,
        out_shape=jax.ShapeDtypeStruct((R_pad, 1), jnp.float32),
        grid=grid,
        in_specs=[
            pl.BlockSpec(memory_space=pltpu.MemorySpace.SMEM),        # pos_w scalars
            pl.BlockSpec(memory_space=pltpu.MemorySpace.SMEM),        # pos_b scalar
            pl.BlockSpec((TR, H), lambda i: (i, 0)),                  # w_e row tile
            pl.BlockSpec((TR, N * H), lambda i: (i, 0)),              # packed c_e row tile
            pl.BlockSpec((TR, 1), lambda i: (i, 0)),                  # bias[gram] tile
        ],
        out_specs=pl.BlockSpec((TR, 1), lambda i: (i, 0)),
        compiler_params=pltpu.CompilerParams(
            dimension_semantics=("parallel",),
            vmem_limit_bytes=vmem_limit,
        ),
    )(pos_w, pos_b, w_e, c_e, b_g)

    return out[:R, 0].reshape(B, 1, S)


def init_params(key, vocab_size, embed_dim, neighbor_size, padding_idx=0,
                embed_dtype=jnp.bfloat16):
    k1, k2, k3, k4 = jax.random.split(key, 4)
    word_embed = jax.random.normal(k1, (vocab_size, embed_dim), jnp.float32)
    context_embed = jax.random.normal(k2, (vocab_size, embed_dim), jnp.float32)
    # nn.Embedding padding_idx rows are zero.
    word_embed = word_embed.at[padding_idx].set(0.0).astype(embed_dtype)
    context_embed = context_embed.at[padding_idx].set(0.0).astype(embed_dtype)
    # nn.Conv2d(neighbor_size, 1, 1): weight (1, N, 1, 1) -> (N,), bias (1,)
    pos_w = jax.random.normal(k3, (neighbor_size,), jnp.float32) * 0.1
    pos_b = jax.random.normal(k4, (1,), jnp.float32) * 0.1
    bias = jnp.zeros((vocab_size,), jnp.float32)
    return {
        "word_embed": word_embed,
        "context_embed": context_embed,
        "pos_w": pos_w,
        "pos_b": pos_b,
        "bias": bias,
    }


def vlbl_reference(context_ids, gram_ids, params):
    """Pure-JAX reference mirroring the PyTorch forward (f32 compute)."""
    w_e = params["word_embed"][gram_ids].astype(jnp.float32)        # (B, 1, S, H)
    c_e = params["context_embed"][context_ids].astype(jnp.float32)  # (B, N, S, H)
    pos_w = params["pos_w"].astype(jnp.float32)
    pos_b = params["pos_b"].astype(jnp.float32)
    mixed = jnp.sum(c_e * pos_w[None, :, None, None], axis=1) + pos_b[0]   # (B, S, H)
    sim = jnp.sum(w_e[:, 0] * mixed, axis=-1)[:, None, :]                  # (B, 1, S)
    return sim + params["bias"].astype(jnp.float32)[gram_ids]


if __name__ == "__main__":
    vocab_size = 50
    embed_dim = 32
    neighbor_size = 4
    B, S = 2, 8

    key = jax.random.PRNGKey(0)
    kp, kc, kg = jax.random.split(key, 3)
    params = init_params(kp, vocab_size, embed_dim, neighbor_size)

    context_ids = jax.random.randint(kc, (B, neighbor_size, S), 0, vocab_size, jnp.int32)
    gram_ids = jax.random.randint(kg, (B, 1, S), 0, vocab_size, jnp.int32)

    fwd = jax.jit(functools.partial(vlbl_forward, compute_dtype=jnp.float32))
    out = fwd(context_ids, gram_ids, params)
    jax.block_until_ready(out)

    ref = vlbl_reference(context_ids, gram_ids, params)
    assert out.shape == (B, 1, S)
    assert jnp.allclose(out, ref, atol=1e-4, rtol=1e-4), "mismatch vs reference"
    print("KERNEL_OK")
</pallas_src>

<mosaic_0001>
module attributes {stable_mosaic.version = 11 : i64} {
  func.func @vlbl_kernel(%arg0: i32, %arg1: memref<4xf32, #tpu.memory_space<smem>>, %arg2: memref<1xf32, #tpu.memory_space<smem>>, %arg3: memref<128x32xbf16, #tpu.memory_space<vmem>>, %arg4: memref<128x128xbf16, #tpu.memory_space<vmem>>, %arg5: memref<128x1xf32, #tpu.memory_space<vmem>>, %arg6: memref<128x1xf32, #tpu.memory_space<vmem>>) attributes {dimension_semantics = [#tpu.dimension_semantics<parallel>], iteration_bounds = array<i64: 1>, scalar_prefetch = 0 : i64, scratch_operands = 0 : i64, tpu.core_type = #tpu.core_type<tc>, window_params = [{transform_indices = @transform_0, window_bounds = array<i64: 4>}, {transform_indices = @transform_1, window_bounds = array<i64: 1>}, {transform_indices = @transform_2, window_bounds = array<i64: 128, 32>}, {transform_indices = @transform_3, window_bounds = array<i64: 128, 128>}, {transform_indices = @transform_4, window_bounds = array<i64: 128, 1>}, {transform_indices = @transform_5, window_bounds = array<i64: 128, 1>}]} {
    %c0 = arith.constant 0 : index
    %0 = memref.load %arg1[%c0] : memref<4xf32, #tpu.memory_space<smem>>
    %c0_0 = arith.constant 0 : index
    %c0_1 = arith.constant 0 : index
    %1 = vector.load %arg4[%c0_0, %c0_1] : memref<128x128xbf16, #tpu.memory_space<vmem>>, vector<128x32xbf16>
    %2 = arith.extf %1 : vector<128x32xbf16> to vector<128x32xf32>
    %3 = vector.broadcast %0 : f32 to vector<128x32xf32>
    %4 = arith.mulf %3, %2 : vector<128x32xf32>
    %c1 = arith.constant 1 : index
    %5 = memref.load %arg1[%c1] : memref<4xf32, #tpu.memory_space<smem>>
    %c0_2 = arith.constant 0 : index
    %c32 = arith.constant 32 : index
    %6 = vector.load %arg4[%c0_2, %c32] : memref<128x128xbf16, #tpu.memory_space<vmem>>, vector<128x32xbf16>
    %7 = arith.extf %6 : vector<128x32xbf16> to vector<128x32xf32>
    %8 = vector.broadcast %5 : f32 to vector<128x32xf32>
    %9 = arith.mulf %8, %7 : vector<128x32xf32>
    %10 = arith.addf %4, %9 : vector<128x32xf32>
    %c2 = arith.constant 2 : index
    %11 = memref.load %arg1[%c2] : memref<4xf32, #tpu.memory_space<smem>>
    %c0_3 = arith.constant 0 : index
    %c64 = arith.constant 64 : index
    %12 = vector.load %arg4[%c0_3, %c64] : memref<128x128xbf16, #tpu.memory_space<vmem>>, vector<128x32xbf16>
    %13 = arith.extf %12 : vector<128x32xbf16> to vector<128x32xf32>
    %14 = vector.broadcast %11 : f32 to vector<128x32xf32>
    %15 = arith.mulf %14, %13 : vector<128x32xf32>
    %16 = arith.addf %10, %15 : vector<128x32xf32>
    %c3 = arith.constant 3 : index
    %17 = memref.load %arg1[%c3] : memref<4xf32, #tpu.memory_space<smem>>
    %c0_4 = arith.constant 0 : index
    %c96 = arith.constant 96 : index
    %18 = vector.load %arg4[%c0_4, %c96] : memref<128x128xbf16, #tpu.memory_space<vmem>>, vector<128x32xbf16>
    %19 = arith.extf %18 : vector<128x32xbf16> to vector<128x32xf32>
    %20 = vector.broadcast %17 : f32 to vector<128x32xf32>
    %21 = arith.mulf %20, %19 : vector<128x32xf32>
    %22 = arith.addf %16, %21 : vector<128x32xf32>
    %c0_5 = arith.constant 0 : index
    %23 = memref.load %arg2[%c0_5] : memref<1xf32, #tpu.memory_space<smem>>
    %24 = vector.broadcast %23 : f32 to vector<128x32xf32>
    %25 = arith.addf %22, %24 : vector<128x32xf32>
    %c0_6 = arith.constant 0 : index
    %c0_7 = arith.constant 0 : index
    %26 = vector.load %arg3[%c0_6, %c0_7] : memref<128x32xbf16, #tpu.memory_space<vmem>>, vector<128x32xbf16>
    %27 = arith.extf %26 : vector<128x32xbf16> to vector<128x32xf32>
    %28 = arith.mulf %27, %25 : vector<128x32xf32>
    %cst = arith.constant dense<0.000000e+00> : vector<128xf32>
    %29 = vector.multi_reduction <add>, %28, %cst [1] : vector<128x32xf32> to vector<128xf32>
    %30 = vector.shape_cast %29 : vector<128xf32> to vector<128x1xf32>
    %c0_8 = arith.constant 0 : index
    %c0_9 = arith.constant 0 : index
    %31 = vector.load %arg5[%c0_8, %c0_9] : memref<128x1xf32, #tpu.memory_space<vmem>>, vector<128x1xf32>
    %32 = arith.addf %30, %31 : vector<128x1xf32>
    %c0_10 = arith.constant 0 : index
    %c0_11 = arith.constant 0 : index
    %33 = vector.load %arg6[%c0_10, %c0_11] : memref<128x1xf32, #tpu.memory_space<vmem>>, vector<128x1xf32>
    tpu.vector_store %arg6[%c0_10, %c0_11], %32 {strides = array<i32>} : memref<128x1xf32, #tpu.memory_space<vmem>>, vector<128x1xf32>,
    return
  }
  func.func @transform_0(%arg0: i32) -> i32 {
    %c0_i32 = arith.constant 0 : i32
    %c0_i32_0 = arith.constant 0 : i32
    return %c0_i32 : i32
  }
  func.func @transform_1(%arg0: i32) -> i32 {
    %c0_i32 = arith.constant 0 : i32
    %c0_i32_0 = arith.constant 0 : i32
    return %c0_i32 : i32
  }
  func.func @transform_2(%arg0: i32) -> (i32, i32) {
    %c0_i32 = arith.constant 0 : i32
    %c0_i32_0 = arith.constant 0 : i32
    return %arg0, %c0_i32 : i32, i32
  }
  func.func @transform_3(%arg0: i32) -> (i32, i32) {
    %c0_i32 = arith.constant 0 : i32
    %c0_i32_0 = arith.constant 0 : i32
    return %arg0, %c0_i32 : i32, i32
  }
  func.func @transform_4(%arg0: i32) -> (i32, i32) {
    %c0_i32 = arith.constant 0 : i32
    %c0_i32_0 = arith.constant 0 : i32
    return %arg0, %c0_i32 : i32, i32
  }
  func.func @transform_5(%arg0: i32) -> (i32, i32) {
    %c0_i32 = arith.constant 0 : i32
    %c0_i32_0 = arith.constant 0 : i32
    return %arg0, %c0_i32 : i32, i32
  }
}

</mosaic_0001>

<bundles_post_ra>
// kernel: squeeze.1
= control target key start
LH: loop header
LB: loop body
LE: loop exit
PB: predicated region body
PF: predicated region fallthrough
CT: control target
= control target key end

     0   :  { %s85_s0 = inlined_call_operand.vmem [shape: f32[16], index: 0, kind: input, shape index: {}]   ;;  %s86_s1 = inlined_call_operand.hbm [shape: f32[2,1,8], index: 1, kind: output, shape index: {}]  }
   0x1   :  { %v5_v0 = vld [vmem:[%s85_s0] sm:$0x1] }
   0x2   :  { %2 = vsyncpa [#allocation1], 0  ;;  %6 = vst [vmem:[#allocation3] sm:$0x1] %v5_v0  ;;  %vm8_vm0 = vcmask 64512   ;;  %s58_s0 = smov 120  }
   0x3   :  { %s59_s8 = smov [#allocation0]  }
   0x4   :  { %s26_s9 = sshll.u32 %s59_s8, 4  ;;  %s27_s9 = int_to_ptr.vmem [resolvable:$true] %s26_s9 }
   0x5   :  { %s34_s10 = scalar_lea.vmem %s27_s9, 32  ;;  %p39_p1 = scmp.lt.s32.totalorder %s27_s9, %s27_s9 }
   0x6   :  { %p35_p0 = scmp.ne.s32.totalorder %s27_s9, %s34_s10  ;;  %p40_p2 = scmp.lt.s32.totalorder %s34_s10, %s34_s10 }
   0x8   :  { %p41_p3 = por %p40_p2, %p39_p1 }
   0x9   :  { %v10_v1 = vld [vmem:[#allocation3] sm:$0x1]  }
   0xa   :  { %v7_v2 = vld [vmem:[#allocation3] sm:$0x1]   ;;  %11 = vrot.lane.b32.xlu0 %v10_v1, %s58_s0  ;;  %p42_p4 = pnand %p41_p3, %p35_p0 }
   0xb   :  { %9 = vst.msk [vmem:[#allocation2] sm:$0x1] %vm8_vm0, %v7_v2  }
  0x7c   :  { %v12_v3 = vpop.permute.xlu0 %11  }
  0x7d   :  { %15 = vst.msk [vmem:[#allocation2 + $0x1] sm:$0x1] %vm8_vm0, %v12_v3  }
  0x84   :  { %v19_v4 = vld [vmem:[#allocation2] sm:$0x3] }
  0x85   :  { %21 = vst [vmem:[#allocation0] sm:$0x3] %v19_v4 }
  0x86   :  { %45 = shalt.err (!%p42_p4)
}
  0x87   :  { %s46_s13 = scalar_lea.hbm %s86_s1, 32 }
  0x88   :  { %p47_p5 = scmp.ne.s32.totalorder %s86_s1, %s46_s13  ;;  %p50_p6 = scmp.lt.u32.totalorder %s46_s13, %s86_s1 }
  0x8a   :  { %p52_p7 = pnand %p50_p6, %p47_p5 }
  0x8c   :  { %55 = shalt.err (!%p52_p7)
}
  0x8d   :  { %29 = dma.vmem_to_hbm [thread:$0]  %s27_s9, 32, %s86_s1, [#allocation1]  }
  0x8e   :  { %56 = dma.done.wait [#allocation1], 32  }
  0x8f   :  { %57 = vsyncadd [#allocation1], 4294967264 }
  0x90   :  { %31 = vsyncpa [#allocation1], 1 }

// kernel: vlbl_forward.1
= control target key start
LH: loop header
LB: loop body
LE: loop exit
PB: predicated region body
PF: predicated region fallthrough
CT: control target
= control target key end

     0   :  { %11 = vsyncpa [#allocation4], 0  ;;  %s1083_s0 = inlined_call_operand.vmem [shape: f32[4], index: 0, kind: input, shape index: {}]   ;;  %s1084_s1 = inlined_call_operand.<no memory space> [shape: f32[1], index: 1, kind: input, shape index: {}]   ;;  %s1085_s2 = inlined_call_operand.vmem [shape: bf16[128,32], index: 2, kind: input, shape index: {}]   ;;  %s1086_s3 = inlined_call_operand.vmem [shape: bf16[128,128], index: 3, kind: input, shape index: {}]   ;;  %s1087_s4 = inlined_call_operand.vmem [shape: f32[128,1], index: 4, kind: input, shape index: {}]   ;;  %s1088_s5 = inlined_call_operand.vmem [shape: f32[128,1], index: 5, kind: output, shape index: {}]  }
   0x1   :  { %s18_s20 = sshll.u32 %s1083_s0, 4  ;;  %s19_s20 = int_to_ptr.vmem [resolvable:$true] %s18_s20 }
   0x2   :  { %s632_s21 = scalar_lea.vmem %s19_s20, 16  ;;  %p637_p1 = scmp.lt.s32.totalorder %s19_s20, %s19_s20 }
   0x3   :  { %p633_p0 = scmp.ne.s32.totalorder %s19_s20, %s632_s21  ;;  %p638_p2 = scmp.lt.s32.totalorder %s632_s21, %s632_s21 }
   0x5   :  { %p639_p3 = por %p638_p2, %p637_p1 }
   0x7   :  { %p640_p4 = pnand %p639_p3, %p633_p0 }
   0x9   :  { %643 = shalt.err (!%p640_p4)
}
   0xa   :  { %s646_s22 = smov [#allocation3]  }
   0xb   :  { %21 = dma.vmem_to_smem %s19_s20, 16, %s646_s22, [#allocation4]  }
   0xc   :  { %644 = dma.done.wait [#allocation4], 16  }
   0xd   :  { %645 = vsyncadd [#allocation4], 4294967280 }
   0xe   :  { %33 = sfence }
   0xf   :  { %v614_v0 = vld [vmem:[%s1086_s3 + $0x8] sm:$0xff]   ;;  %s547_s25 = sld [smem:[#allocation3 + $0x1]]  ;;  %v551_v1 = vld [vmem:[%s1086_s3] sm:$0xff]   ;;  %v615_v7 = vld [vmem:[%s1086_s3 + $0x10] sm:$0xff]   ;;  %s647_s29 = smov 96   ;;  %vm444_vm0 = vcmask 261120  }
  0x10   :  { %v689_v2 = vunpack.c.l.bf16 %v614_v0  ;;  %v691_v3 = vunpack.c.l.bf16 %v551_v1  ;;  %v693_v4 = vunpack.c.h.bf16 %v614_v0  ;;  %v695_v5 = vunpack.c.h.bf16 %v551_v1  ;;  %v616_v14 = vld [vmem:[%s1086_s3 + $0x18] sm:$0xff]   ;;  %v617_v19 = vld [vmem:[%s1086_s3 + $0x20] sm:$0xff]   ;;  %v618_v24 = vld [vmem:[%s1086_s3 + $0x28] sm:$0xff]   ;;  %s548_s15 = sld [smem:[#allocation3 + $0x2]]  ;;  %s549_s16 = sld [smem:[#allocation3 + $0x3]] }
  0x11   :  { %v706_v12 = vunpack.c.h.bf16 %v615_v7  ;;  %v708_v13 = vunpack.c.l.bf16 %v615_v7  ;;  %v717_v17 = vunpack.c.h.bf16 %v616_v14  ;;  %v719_v18 = vunpack.c.l.bf16 %v616_v14  ;;  %v619_v29 = vld [vmem:[%s1086_s3 + $0x30] sm:$0xff]   ;;  %v620_v34 = vld [vmem:[%s1086_s3 + $0x38] sm:$0xff]   ;;  %s648_s3 = smov 64   ;;  %s649_s17 = smov 32  }
  0x12   :  { %v728_v22 = vunpack.c.h.bf16 %v617_v19  ;;  %v730_v23 = vunpack.c.l.bf16 %v617_v19  ;;  %v739_v27 = vunpack.c.h.bf16 %v618_v24  ;;  %v741_v28 = vunpack.c.l.bf16 %v618_v24  ;;  %s34_s18 = sld [smem:[#allocation3]] }
  0x13   :  { %v750_v32 = vunpack.c.h.bf16 %v619_v29  ;;  %v752_v33 = vunpack.c.l.bf16 %v619_v29  ;;  %v761_v37 = vunpack.c.h.bf16 %v620_v34  ;;  %v763_v38 = vunpack.c.l.bf16 %v620_v34 }
  0x14   :  { %vm525_vm1 = vcmask 7168  }
  0x15   :  { %v85_v6 = vstv %s547_s25 }
  0x16   :  { %v88_v8 = vmul.f32 %v689_v2, %v85_v6  ;;  %v86_v9 = vmul.f32 %v691_v3, %v85_v6  ;;  %v89_v10 = vmul.f32 %v693_v4, %v85_v6  ;;  %v87_v11 = vmul.f32 %v695_v5, %v85_v6 }
  0x17   :  { %v91_v15 = vmul.f32 %v706_v12, %v85_v6  ;;  %v90_v16 = vmul.f32 %v708_v13, %v85_v6  ;;  %v93_v20 = vmul.f32 %v717_v17, %v85_v6  ;;  %v92_v21 = vmul.f32 %v719_v18, %v85_v6 }
  0x18   :  { %122 = vrot.lane.b32.xlu1 %v88_v8, %s647_s29  ;;  %118 = vrot.lane.b32.xlu0 %v86_v9, %s647_s29  ;;  %v95_v25 = vmul.f32 %v728_v22, %v85_v6  ;;  %v94_v26 = vmul.f32 %v730_v23, %v85_v6  ;;  %v97_v30 = vmul.f32 %v739_v27, %v85_v6  ;;  %v183_v41 = vstv %s548_s15 }
  0x19   :  { %v96_v31 = vmul.f32 %v741_v28, %v85_v6  ;;  %v99_v35 = vmul.f32 %v750_v32, %v85_v6  ;;  %v98_v36 = vmul.f32 %v752_v33, %v85_v6  ;;  %v101_v39 = vmul.f32 %v761_v37, %v85_v6 }
  0x1a   :  { %v100_v40 = vmul.f32 %v763_v38, %v85_v6  ;;  %v185_v42 = vmul.f32 %v695_v5, %v183_v41  ;;  %v184_v43 = vmul.f32 %v691_v3, %v183_v41  ;;  %v187_v44 = vmul.f32 %v693_v4, %v183_v41 }
  0x1b   :  { %v186_v45 = vmul.f32 %v689_v2, %v183_v41  ;;  %v189_v46 = vmul.f32 %v706_v12, %v183_v41  ;;  %v188_v47 = vmul.f32 %v708_v13, %v183_v41  ;;  %v191_v48 = vmul.f32 %v717_v17, %v183_v41 }
  0x1c   :  { %124 = vrot.lane.b32.xlu1 %v89_v10, %s647_s29  ;;  %120 = vrot.lane.b32.xlu0 %v87_v11, %s647_s29  ;;  %v190_v49 = vmul.f32 %v719_v18, %v183_v41  ;;  %v193_v50 = vmul.f32 %v728_v22, %v183_v41  ;;  %v192_v51 = vmul.f32 %v730_v23, %v183_v41  ;;  %v281_v58 = vstv %s549_s16 }
  0x1d   :  { %v195_v52 = vmul.f32 %v739_v27, %v183_v41  ;;  %v194_v53 = vmul.f32 %v741_v28, %v183_v41  ;;  %v197_v54 = vmul.f32 %v750_v32, %v183_v41  ;;  %v196_v55 = vmul.f32 %v752_v33, %v183_v41 }
  0x1e   :  { %v199_v56 = vmul.f32 %v761_v37, %v183_v41  ;;  %v198_v57 = vmul.f32 %v763_v38, %v183_v41  ;;  %v283_v59 = vmul.f32 %v695_v5, %v281_v58  ;;  %v282_v60 = vmul.f32 %v691_v3, %v281_v58 }
  0x1f   :  { %v285_v61 = vmul.f32 %v693_v4, %v281_v58  ;;  %v284_v62 = vmul.f32 %v689_v2, %v281_v58  ;;  %v287_v63 = vmul.f32 %v706_v12, %v281_v58  ;;  %v286_v0 = vmul.f32 %v708_v13, %v281_v58 }
  0x20   :  { %128 = vrot.lane.b32.xlu1 %v91_v15, %s647_s29  ;;  %126 = vrot.lane.b32.xlu0 %v90_v16, %s647_s29  ;;  %v289_v1 = vmul.f32 %v717_v17, %v281_v58  ;;  %v288_v6 = vmul.f32 %v719_v18, %v281_v58  ;;  %v291_v7 = vmul.f32 %v728_v22, %v281_v58  ;;  %v819_v19 = vstv %s34_s18 }
  0x21   :  { %v290_v8 = vmul.f32 %v730_v23, %v281_v58  ;;  %v293_v9 = vmul.f32 %v739_v27, %v281_v58  ;;  %v292_v10 = vmul.f32 %v741_v28, %v281_v58  ;;  %v295_v11 = vmul.f32 %v750_v32, %v281_v58 }
  0x22   :  { %v294_v14 = vmul.f32 %v752_v33, %v281_v58  ;;  %v297_v15 = vmul.f32 %v761_v37, %v281_v58  ;;  %v296_v16 = vmul.f32 %v763_v38, %v281_v58  ;;  %v73_v34 = vmul.f32 %v706_v12, %v819_v19 }
  0x23   :  { %v79_v12 = vmul.f32 %v739_v27, %v819_v19 }
  0x24   :  { %132 = vrot.lane.b32.xlu1 %v93_v20, %s647_s29  ;;  %130 = vrot.lane.b32.xlu0 %v92_v21, %s647_s29  ;;  %v70_v20 = vmul.f32 %v689_v2, %v819_v19 }
  0x28   :  { %136 = vrot.lane.b32.xlu1 %v95_v25, %s647_s29  ;;  %134 = vrot.lane.b32.xlu0 %v94_v26, %s647_s29  ;;  %v71_v26 = vmul.f32 %v693_v4, %v819_v19  ;;  %v77_v4 = vmul.f32 %v728_v22, %v819_v19 }
  0x2c   :  { %140 = vrot.lane.b32.xlu1 %v97_v30, %s647_s29  ;;  %138 = vrot.lane.b32.xlu0 %v96_v31, %s647_s29 }
  0x30   :  { %144 = vrot.lane.b32.xlu1 %v99_v35, %s647_s29  ;;  %142 = vrot.lane.b32.xlu0 %v98_v36, %s647_s29 }
  0x34   :  { %148 = vrot.lane.b32.xlu1 %v101_v39, %s647_s29  ;;  %146 = vrot.lane.b32.xlu0 %v100_v40, %s647_s29  ;;  %v75_v40 = vmul.f32 %v717_v17, %v819_v19 }
  0x38   :  { %218 = vrot.lane.b32.xlu1 %v185_v42, %s648_s3  ;;  %216 = vrot.lane.b32.xlu0 %v184_v43, %s648_s3 }
  0x3c   :  { %222 = vrot.lane.b32.xlu1 %v187_v44, %s648_s3  ;;  %220 = vrot.lane.b32.xlu0 %v186_v45, %s648_s3 }
  0x40   :  { %226 = vrot.lane.b32.xlu1 %v189_v46, %s648_s3  ;;  %224 = vrot.lane.b32.xlu0 %v188_v47, %s648_s3 }
  0x44   :  { %230 = vrot.lane.b32.xlu1 %v191_v48, %s648_s3  ;;  %228 = vrot.lane.b32.xlu0 %v190_v49, %s648_s3  ;;  %v81_v48 = vmul.f32 %v750_v32, %v819_v19 }
  0x48   :  { %234 = vrot.lane.b32.xlu1 %v193_v50, %s648_s3  ;;  %232 = vrot.lane.b32.xlu0 %v192_v51, %s648_s3  ;;  %v83_v51 = vmul.f32 %v761_v37, %v819_v19 }
  0x4c   :  { %238 = vrot.lane.b32.xlu1 %v195_v52, %s648_s3  ;;  %236 = vrot.lane.b32.xlu0 %v194_v53, %s648_s3 }
  0x50   :  { %242 = vrot.lane.b32.xlu1 %v197_v54, %s648_s3  ;;  %240 = vrot.lane.b32.xlu0 %v196_v55, %s648_s3 }
  0x54   :  { %246 = vrot.lane.b32.xlu1 %v199_v56, %s648_s3  ;;  %244 = vrot.lane.b32.xlu0 %v198_v57, %s648_s3 }
  0x58   :  { %316 = vrot.lane.b32.xlu1 %v283_v59, %s649_s17  ;;  %314 = vrot.lane.b32.xlu0 %v282_v60, %s649_s17 }
  0x5c   :  { %320 = vrot.lane.b32.xlu1 %v285_v61, %s649_s17  ;;  %318 = vrot.lane.b32.xlu0 %v284_v62, %s649_s17 }
  0x60   :  { %324 = vrot.lane.b32.xlu1 %v287_v63, %s649_s17  ;;  %322 = vrot.lane.b32.xlu0 %v286_v0, %s649_s17 }
  0x64   :  { %328 = vrot.lane.b32.xlu1 %v289_v1, %s649_s17  ;;  %326 = vrot.lane.b32.xlu0 %v288_v6, %s649_s17  ;;  %v68_v6 = vmul.f32 %v691_v3, %v819_v19  ;;  %v887_v3 = vstv %s1084_s1 }
  0x68   :  { %332 = vrot.lane.b32.xlu1 %v291_v7, %s649_s17  ;;  %330 = vrot.lane.b32.xlu0 %v290_v8, %s649_s17  ;;  %v69_v7 = vmul.f32 %v695_v5, %v819_v19 }
  0x6c   :  { %336 = vrot.lane.b32.xlu1 %v293_v9, %s649_s17  ;;  %334 = vrot.lane.b32.xlu0 %v292_v10, %s649_s17 }
  0x70   :  { %340 = vrot.lane.b32.xlu1 %v295_v11, %s649_s17  ;;  %338 = vrot.lane.b32.xlu0 %v294_v14, %s649_s17  ;;  %v583_v14 = vld [vmem:[%s1085_s2] sm:$0xff]  }
  0x74   :  { %344 = vrot.lane.b32.xlu1 %v297_v15, %s649_s17  ;;  %342 = vrot.lane.b32.xlu0 %v296_v16, %s649_s17 }
  0x8a   :  { %v123_v21 = vpop.permute.xlu1 %122  ;;  %v119_v24 = vpop.permute.xlu0 %118 }
  0x8b   :  { %v168_v25 = vadd.f32 %v123_v21, %v70_v20  ;;  %v166_v10 = vadd.f32 %v119_v24, %v68_v6  ;;  %v72_v20 = vmul.f32 %v708_v13, %v819_v19  ;;  %v585_v24 = vunpack.c.h.bf16 %v583_v14 }
  0x8e   :  { %v125_v29 = vpop.permute.xlu1 %124  ;;  %v121_v30 = vpop.permute.xlu0 %120 }
  0x8f   :  { %v169_v31 = vadd.f32 %v125_v29, %v71_v26  ;;  %v167_v11 = vadd.f32 %v121_v30, %v69_v7  ;;  %v584_v30 = vunpack.c.l.bf16 %v583_v14  ;;  %v76_v7 = vmul.f32 %v730_v23, %v819_v19 }
  0x92   :  { %v129_v35 = vpop.permute.xlu1 %128  ;;  %v127_v36 = vpop.permute.xlu0 %126 }
  0x93   :  { %v827_v39 = vadd.f32 %v129_v35, %v73_v34  ;;  %v621_v34 = vld [vmem:[%s1085_s2 + $0x8] sm:$0xff]  }
  0x96   :  { %v133_v2 = vpop.permute.xlu1 %132  ;;  %v831_v41 = vpop.permute.xlu0 %130 }
  0x97   :  { %v833_v42 = vadd.f32 %v133_v2, %v75_v40 }
  0x9a   :  { %v137_v43 = vpop.permute.xlu1 %136  ;;  %v837_v44 = vpop.permute.xlu0 %134 }
  0x9b   :  { %v839_v45 = vadd.f32 %v137_v43, %v77_v4  ;;  %v170_v4 = vadd.f32 %v127_v36, %v72_v20  ;;  %v74_v43 = vmul.f32 %v719_v18, %v819_v19 }
  0x9e   :  { %v141_v46 = vpop.permute.xlu1 %140  ;;  %v843_v47 = vpop.permute.xlu0 %138 }
  0x9f   :  { %v845_v17 = vadd.f32 %v141_v46, %v79_v12 }
  0xa2   :  { %v145_v49 = vpop.permute.xlu1 %144  ;;  %v849_v50 = vpop.permute.xlu0 %142 }
  0xa3   :  { %v851_v22 = vadd.f32 %v145_v49, %v81_v48  ;;  %v588_v48 = vunpack.c.l.bf16 %v621_v34 }
  0xa6   :  { %v149_v52 = vpop.permute.xlu1 %148  ;;  %v855_v53 = vpop.permute.xlu0 %146 }
  0xa7   :  { %v857_v27 = vadd.f32 %v149_v52, %v83_v51 }
  0xaa   :  { %v219_v54 = vpop.permute.xlu1 %218  ;;  %v217_v55 = vpop.permute.xlu0 %216 }
  0xab   :  { %v265_v15 = vadd.f32 %v219_v54, %v167_v11  ;;  %v264_v16 = vadd.f32 %v217_v55, %v166_v10 }
  0xae   :  { %v223_v56 = vpop.permute.xlu1 %222  ;;  %v221_v57 = vpop.permute.xlu0 %220 }
  0xaf   :  { %v267_v35 = vadd.f32 %v223_v56, %v169_v31  ;;  %v266_v40 = vadd.f32 %v221_v57, %v168_v25  ;;  %v622_v25 = vld [vmem:[%s1085_s2 + $0x10] sm:$0xff]   ;;  %v589_v56 = vunpack.c.h.bf16 %v621_v34 }
  0xb0   :  { %v592_v14 = vunpack.c.l.bf16 %v622_v25 }
  0xb2   :  { %v227_v58 = vpop.permute.xlu1 %226  ;;  %v225_v59 = vpop.permute.xlu0 %224 }
  0xb3   :  { %v269_v31 = vadd.f32 %v227_v58, %v827_v39  ;;  %v268_v55 = vadd.f32 %v225_v59, %v170_v4  ;;  %v172_v39 = vadd.f32 %v831_v41, %v74_v43  ;;  %v174_v41 = vadd.f32 %v837_v44, %v76_v7  ;;  %v624_v44 = vld [vmem:[%s1085_s2 + $0x20] sm:$0xff]  }
  0xb6   :  { %v231_v32 = vpop.permute.xlu1 %230  ;;  %v229_v60 = vpop.permute.xlu0 %228 }
  0xba   :  { %v859_v61 = vpop.permute.xlu1 %234  ;;  %v861_v62 = vpop.permute.xlu0 %232 }
  0xbe   :  { %v863_v63 = vpop.permute.xlu1 %238  ;;  %v865_v37 = vpop.permute.xlu0 %236 }
  0xc2   :  { %v867_v0 = vpop.permute.xlu1 %242  ;;  %v869_v1 = vpop.permute.xlu0 %240 }
  0xc6   :  { %v875_v8 = vpop.permute.xlu1 %246  ;;  %v877_v9 = vpop.permute.xlu0 %244 }
  0xca   :  { %v317_v5 = vpop.permute.xlu1 %316  ;;  %v315_v21 = vpop.permute.xlu0 %314 }
  0xcb   :  { %v363_v26 = vadd.f32 %v317_v5, %v265_v15  ;;  %v362_v29 = vadd.f32 %v315_v21, %v264_v16  ;;  %v271_v16 = vadd.f32 %v231_v32, %v833_v42  ;;  %v623_v5 = vld [vmem:[%s1085_s2 + $0x18] sm:$0xff]   ;;  %v593_v21 = vunpack.c.h.bf16 %v622_v25 }
  0xcc   :  { %v597_v43 = vunpack.c.h.bf16 %v623_v5  ;;  %v600_v25 = vunpack.c.l.bf16 %v624_v44 }
  0xcd   :  { %v381_v2 = vadd.f32 %v887_v3, %v363_v26  ;;  %v380_v13 = vadd.f32 %v887_v3, %v362_v29  ;;  %v270_v26 = vadd.f32 %v229_v60, %v172_v39  ;;  %v273_v60 = vadd.f32 %v859_v61, %v839_v45 }
  0xce   :  { %v321_v12 = vpop.permute.xlu1 %320  ;;  %v319_v46 = vpop.permute.xlu0 %318  ;;  %v80_v45 = vmul.f32 %v752_v33, %v819_v19 }
  0xcf   :  { %v365_v49 = vadd.f32 %v321_v12, %v267_v35  ;;  %v364_v51 = vadd.f32 %v319_v46, %v266_v40  ;;  %v429_v52 = vmul.f32 %v585_v24, %v381_v2  ;;  %v428_v54 = vmul.f32 %v584_v30, %v380_v13 }
  0xd0   :  { %v78_v30 = vmul.f32 %v741_v28, %v819_v19  ;;  %v596_v2 = vunpack.c.l.bf16 %v623_v5  ;;  %v272_v13 = vadd.f32 %v861_v62, %v174_v41  ;;  %v178_v7 = vadd.f32 %v849_v50, %v80_v45  ;;  %v626_v50 = vld [vmem:[%s1085_s2 + $0x30] sm:$0xff]  }
  0xd1   :  { %v383_v36 = vadd.f32 %v887_v3, %v365_v49  ;;  %v382_v18 = vadd.f32 %v887_v3, %v364_v51  ;;  %v448_v57 = vsel %vm444_vm0, %v429_v52, 0.0  ;;  %v445_v6 = vsel %vm444_vm0, %v428_v54, 0.0 }
  0xd2   :  { %v325_v10 = vpop.permute.xlu1 %324  ;;  %v323_v11 = vpop.permute.xlu0 %322  ;;  %449 = vadd.xlane.f32.xlu1 %v448_v57  ;;  %446 = vadd.xlane.f32.xlu0 %v445_v6  ;;  %v176_v49 = vadd.f32 %v843_v47, %v78_v30  ;;  %v625_v47 = vld [vmem:[%s1085_s2 + $0x28] sm:$0xff]  }
  0xd3   :  { %v367_v58 = vadd.f32 %v325_v10, %v269_v31  ;;  %v366_v59 = vadd.f32 %v323_v11, %v268_v55  ;;  %v430_v15 = vmul.f32 %v588_v48, %v382_v18  ;;  %v431_v20 = vmul.f32 %v589_v56, %v383_v36 }
  0xd4   :  { %v275_v31 = vadd.f32 %v863_v63, %v845_v17  ;;  %v274_v55 = vadd.f32 %v865_v37, %v176_v49  ;;  %v601_v36 = vunpack.c.h.bf16 %v624_v44  ;;  %v82_v17 = vmul.f32 %v763_v38, %v819_v19 }
  0xd5   :  { %v385_v23 = vadd.f32 %v887_v3, %v367_v58  ;;  %v384_v29 = vadd.f32 %v887_v3, %v366_v59  ;;  %v451_v24 = vsel %vm444_vm0, %v430_v15, 0.0  ;;  %v454_v4 = vsel %vm444_vm0, %v431_v20, 0.0 }
  0xd6   :  { %v329_v34 = vpop.permute.xlu1 %328  ;;  %v327_v42 = vpop.permute.xlu0 %326  ;;  %452 = vadd.xlane.f32.xlu0 %v451_v24  ;;  %v604_v39 = vunpack.c.l.bf16 %v625_v47  ;;  %v277_v58 = vadd.f32 %v867_v0, %v851_v22  ;;  %v276_v59 = vadd.f32 %v869_v1, %v178_v7  ;;  %v605_v38 = vunpack.c.h.bf16 %v625_v47 }
  0xd7   :  { %v369_v32 = vadd.f32 %v329_v34, %v271_v16  ;;  %v368_v35 = vadd.f32 %v327_v42, %v270_v26  ;;  %v432_v40 = vmul.f32 %v592_v14, %v384_v29  ;;  %v433_v48 = vmul.f32 %v593_v21, %v385_v23  ;;  %v627_v34 = vld [vmem:[%s1085_s2 + $0x38] sm:$0xff]  }
  0xd8   :  { %v180_v21 = vadd.f32 %v855_v53, %v82_v17  ;;  %v608_v29 = vunpack.c.l.bf16 %v626_v50  ;;  %v279_v24 = vadd.f32 %v875_v8, %v857_v27  ;;  %v609_v42 = vunpack.c.h.bf16 %v626_v50  ;;  %v499_v17 = vld [vmem:[%s1087_s4 + $0x30] sm:$0xff] }
  0xd9   :  { %v387_v28 = vadd.f32 %v887_v3, %v369_v32  ;;  %v386_v12 = vadd.f32 %v887_v3, %v368_v35  ;;  %v457_v46 = vsel %vm444_vm0, %v432_v40, 0.0  ;;  %v460_v6 = vsel %vm444_vm0, %v433_v48, 0.0 }
  0xda   :  { %v333_v61 = vpop.permute.xlu1 %332  ;;  %v331_v62 = vpop.permute.xlu0 %330  ;;  %458 = vadd.xlane.f32.xlu1 %v457_v46  ;;  %455 = vadd.xlane.f32.xlu0 %v454_v4  ;;  %v278_v41 = vadd.f32 %v877_v9, %v180_v21  ;;  %v613_v44 = vunpack.c.h.bf16 %v627_v34 }
  0xdb   :  { %v371_v51 = vadd.f32 %v333_v61, %v273_v60  ;;  %v370_v52 = vadd.f32 %v331_v62, %v272_v13  ;;  %v434_v54 = vmul.f32 %v596_v2, %v386_v12  ;;  %v435_v56 = vmul.f32 %v597_v43, %v387_v28 }
  0xdc   :  { %v612_v13 = vunpack.c.l.bf16 %v627_v34 }
  0xdd   :  { %v389_v33 = vadd.f32 %v887_v3, %v371_v51  ;;  %v388_v18 = vadd.f32 %v887_v3, %v370_v52  ;;  %v463_v57 = vsel %vm444_vm0, %v434_v54, 0.0  ;;  %v466_v15 = vsel %vm444_vm0, %v435_v56, 0.0  ;;  %v493_v51 = vld [vmem:[%s1087_s4] sm:$0xff] }
  0xde   :  { %v337_v63 = vpop.permute.xlu1 %336  ;;  %v335_v37 = vpop.permute.xlu0 %334  ;;  %464 = vadd.xlane.f32.xlu1 %v463_v57  ;;  %461 = vadd.xlane.f32.xlu0 %v460_v6 }
  0xdf   :  { %v373_v10 = vadd.f32 %v337_v63, %v275_v31  ;;  %v372_v11 = vadd.f32 %v335_v37, %v274_v55  ;;  %v436_v14 = vmul.f32 %v600_v25, %v388_v18  ;;  %v437_v5 = vmul.f32 %v601_v36, %v389_v33  ;;  %v495_v55 = vld [vmem:[%s1087_s4 + $0x10] sm:$0xff]  ;;  %v497_v36 = vld [vmem:[%s1087_s4 + $0x20] sm:$0xff]  ;;  %v496_v33 = vld [vmem:[%s1087_s4 + $0x18] sm:$0xff] }
  0xe0   :  { %v498_v63 = vld [vmem:[%s1087_s4 + $0x28] sm:$0xff] }
  0xe1   :  { %v391_v19 = vadd.f32 %v887_v3, %v373_v10  ;;  %v390_v16 = vadd.f32 %v887_v3, %v372_v11  ;;  %v469_v20 = vsel %vm444_vm0, %v436_v14, 0.0  ;;  %v472_v40 = vsel %vm444_vm0, %v437_v5, 0.0 }
  0xe2   :  { %v341_v26 = vpop.permute.xlu1 %340  ;;  %v339_v22 = vpop.permute.xlu0 %338  ;;  %470 = vadd.xlane.f32.xlu1 %v469_v20  ;;  %467 = vadd.xlane.f32.xlu0 %v466_v15 }
  0xe3   :  { %v375_v0 = vadd.f32 %v341_v26, %v277_v58  ;;  %v374_v1 = vadd.f32 %v339_v22, %v276_v59  ;;  %v438_v23 = vmul.f32 %v604_v39, %v390_v16  ;;  %v439_v30 = vmul.f32 %v605_v38, %v391_v19  ;;  %v501_v39 = vld [vmem:[%s1087_s4 + $0x40] sm:$0xff]  ;;  %v500_v58 = vld [vmem:[%s1087_s4 + $0x38] sm:$0xff]  ;;  %v503_v19 = vld [vmem:[%s1087_s4 + $0x50] sm:$0xff] }
  0xe4   :  { %v502_v16 = vld [vmem:[%s1087_s4 + $0x48] sm:$0xff]  ;;  %v505_v22 = vld [vmem:[%s1087_s4 + $0x60] sm:$0xff] }
  0xe5   :  { %v393_v53 = vadd.f32 %v887_v3, %v375_v0  ;;  %v392_v32 = vadd.f32 %v887_v3, %v374_v1  ;;  %v475_v35 = vsel %vm444_vm0, %v438_v23, 0.0  ;;  %v478_v4 = vsel %vm444_vm0, %v439_v30, 0.0  ;;  %v504_v0 = vld [vmem:[%s1087_s4 + $0x58] sm:$0xff]  ;;  %v506_v30 = vld [vmem:[%s1087_s4 + $0x68] sm:$0xff] }
  0xe6   :  { %v345_v2 = vpop.permute.xlu1 %344  ;;  %v343_v60 = vpop.permute.xlu0 %342  ;;  %476 = vadd.xlane.f32.xlu1 %v475_v35  ;;  %473 = vadd.xlane.f32.xlu0 %v472_v40  ;;  %v508_v35 = vld [vmem:[%s1087_s4 + $0x78] sm:$0xff] }
  0xe7   :  { %v377_v27 = vadd.f32 %v345_v2, %v279_v24  ;;  %v376_v8 = vadd.f32 %v343_v60, %v278_v41  ;;  %v440_v9 = vmul.f32 %v608_v29, %v392_v32  ;;  %v441_v46 = vmul.f32 %v609_v42, %v393_v53  ;;  %v507_v41 = vld [vmem:[%s1087_s4 + $0x70] sm:$0xff] }
  0xe9   :  { %v395_v43 = vadd.f32 %v887_v3, %v377_v27  ;;  %v394_v28 = vadd.f32 %v887_v3, %v376_v8  ;;  %v481_v12 = vsel %vm444_vm0, %v440_v9, 0.0  ;;  %v484_v45 = vsel %vm444_vm0, %v441_v46, 0.0  ;;  %v494_v3 = vld [vmem:[%s1087_s4 + $0x8] sm:$0xff] }
  0xea   :  { %482 = vadd.xlane.f32.xlu1 %v481_v12  ;;  %479 = vadd.xlane.f32.xlu0 %v478_v4 }
  0xeb   :  { %v442_v48 = vmul.f32 %v612_v13, %v394_v28  ;;  %v443_v61 = vmul.f32 %v613_v44, %v395_v43 }
  0xed   :  { %v487_v49 = vsel %vm444_vm0, %v442_v48, 0.0  ;;  %v490_v62 = vsel %vm444_vm0, %v443_v61, 0.0 }
  0xee   :  { %488 = vadd.xlane.f32.xlu1 %v487_v49  ;;  %485 = vadd.xlane.f32.xlu0 %v484_v45 }
  0xf2   :  { %491 = vadd.xlane.f32.xlu0 %v490_v62 }
 0x15f   :  { %v450_v52 = vpop.xlane.xlu1 %449  ;;  %v447_v54 = vpop.xlane.xlu0 %446 }
 0x160   :  { %v510_v25 = vadd.f32 %v494_v3, %v450_v52  ;;  %v509_v31 = vadd.f32 %v493_v51, %v447_v54 }
 0x162   :  { %527 = vst.msk [vmem:[%s1088_s5 + $0x8] sm:$0xff] %vm525_vm1, %v510_v25  ;;  %526 = vst.msk [vmem:[%s1088_s5] sm:$0xff] %vm525_vm1, %v509_v31 }
 0x163   :  { %v453_v56 = vpop.xlane.xlu0 %452 }
 0x164   :  { %v511_v47 = vadd.f32 %v495_v55, %v453_v56 }
 0x166   :  { %528 = vst.msk [vmem:[%s1088_s5 + $0x10] sm:$0xff] %vm525_vm1, %v511_v47 }
 0x167   :  { %v459_v18 = vpop.xlane.xlu1 %458  ;;  %v456_v57 = vpop.xlane.xlu0 %455 }
 0x168   :  { %v513_v6 = vadd.f32 %v497_v36, %v459_v18  ;;  %v512_v7 = vadd.f32 %v496_v33, %v456_v57 }
 0x16a   :  { %530 = vst.msk [vmem:[%s1088_s5 + $0x20] sm:$0xff] %vm525_vm1, %v513_v6  ;;  %529 = vst.msk [vmem:[%s1088_s5 + $0x18] sm:$0xff] %vm525_vm1, %v512_v7 }
 0x16b   :  { %v465_v37 = vpop.xlane.xlu1 %464  ;;  %v462_v10 = vpop.xlane.xlu0 %461 }
 0x16c   :  { %v515_v11 = vadd.f32 %v499_v17, %v465_v37  ;;  %v514_v14 = vadd.f32 %v498_v63, %v462_v10 }
 0x16e   :  { %532 = vst.msk [vmem:[%s1088_s5 + $0x30] sm:$0xff] %vm525_vm1, %v515_v11  ;;  %531 = vst.msk [vmem:[%s1088_s5 + $0x28] sm:$0xff] %vm525_vm1, %v514_v14 }
 0x16f   :  { %v471_v59 = vpop.xlane.xlu1 %470  ;;  %v468_v15 = vpop.xlane.xlu0 %467 }
 0x170   :  { %v517_v50 = vadd.f32 %v501_v39, %v471_v59  ;;  %v516_v38 = vadd.f32 %v500_v58, %v468_v15 }
 0x172   :  { %534 = vst.msk [vmem:[%s1088_s5 + $0x40] sm:$0xff] %vm525_vm1, %v517_v50  ;;  %533 = vst.msk [vmem:[%s1088_s5 + $0x38] sm:$0xff] %vm525_vm1, %v516_v38 }
 0x173   :  { %v477_v20 = vpop.xlane.xlu1 %476  ;;  %v474_v5 = vpop.xlane.xlu0 %473 }
 0x174   :  { %v519_v21 = vadd.f32 %v503_v19, %v477_v20  ;;  %v518_v26 = vadd.f32 %v502_v16, %v474_v5 }
 0x176   :  { %536 = vst.msk [vmem:[%s1088_s5 + $0x50] sm:$0xff] %vm525_vm1, %v519_v21  ;;  %535 = vst.msk [vmem:[%s1088_s5 + $0x48] sm:$0xff] %vm525_vm1, %v518_v26 }
 0x177   :  { %v483_v1 = vpop.xlane.xlu1 %482  ;;  %v480_v23 = vpop.xlane.xlu0 %479 }
 0x178   :  { %v521_v29 = vadd.f32 %v505_v22, %v483_v1  ;;  %v520_v24 = vadd.f32 %v504_v0, %v480_v23 }
 0x17a   :  { %538 = vst.msk [vmem:[%s1088_s5 + $0x60] sm:$0xff] %vm525_vm1, %v521_v29  ;;  %537 = vst.msk [vmem:[%s1088_s5 + $0x58] sm:$0xff] %vm525_vm1, %v520_v24 }
 0x17b   :  { %v489_v34 = vpop.xlane.xlu1 %488  ;;  %v486_v42 = vpop.xlane.xlu0 %485 }
 0x17c   :  { %v523_v53 = vadd.f32 %v507_v41, %v489_v34  ;;  %v522_v32 = vadd.f32 %v506_v30, %v486_v42 }
 0x17e   :  { %540 = vst.msk [vmem:[%s1088_s5 + $0x70] sm:$0xff] %vm525_vm1, %v523_v53  ;;  %539 = vst.msk [vmem:[%s1088_s5 + $0x68] sm:$0xff] %vm525_vm1, %v522_v32 }
 0x17f   :  { %v492_v40 = vpop.xlane.xlu0 %491 }
 0x180   :  { %v524_v2 = vadd.f32 %v508_v35, %v492_v40 }
 0x182   :  { %541 = vst.msk [vmem:[%s1088_s5 + $0x78] sm:$0xff] %vm525_vm1, %v524_v2 }
 0x183   :  { %546 = vsyncpa [#allocation4], 1 }

</bundles_post_ra>
